<compile_context>
chip_gen: v6e
topology: v6e:2x2x1
jax: 0.10.0
libtpu: 0.0.40
codegen_flags: <defaults>
</compile_context>

<pallas_src>
import jax
import jax.numpy as jnp
import numpy as np
from jax.experimental import pallas as pl
from jax.experimental.pallas import tpu as pltpu

NF = 16    # num_filters
NF2 = 32   # num_filters * 2
FC1 = 64   # fc1_size
H = W = 4  # TabularCNN is defined around a 4x4 "tabular image" (see _get_flatten_size)


def _round_up(n, m):
    return ((n + m - 1) // m) * m


def tabular_cnn_kernel(x_ref, e_ref, b1_ref, w2_ref, b2_ref,
                       wfc1_ref, bfc1_ref, wfc2_ref, bfc2_ref, out_ref):
    """One batch tile: four batched matmuls, no per-sample loops."""
    x = x_ref[...]                                                           # (TB, 16)

    # conv1 (1x1, c_in=1) + ReLU: per-filter scale pre-folded into e_ref.
    h1 = jnp.maximum(
        jnp.dot(x, e_ref[...], preferred_element_type=jnp.float32)
        + b1_ref[...], 0.0)                                                  # (TB, 16*NF)

    # conv2 (2x2) + ReLU as a single im2col matmul (K=256, N=288).
    h2 = jnp.maximum(
        jnp.dot(h1, w2_ref[...], preferred_element_type=jnp.float32)
        + b2_ref[...], 0.0)                                                  # (TB, 9*NF2)

    # fc1 + ReLU: single K=288 matmul.
    h3 = jnp.maximum(
        jnp.dot(h2, wfc1_ref[...], preferred_element_type=jnp.float32)
        + bfc1_ref[...], 0.0)                                                # (TB, FC1)

    # fc2: one (TB, 1) slab store.
    out_ref[...] = (jnp.dot(h3, wfc2_ref[...],
                            preferred_element_type=jnp.float32)
                    + bfc2_ref[...])                                         # (TB, 1)


def tabular_cnn_forward(x_nchw, params):
    """Glue: rearrange PyTorch-shaped parameters, then call the Pallas kernel."""
    conv1_w, conv1_b, conv2_w, conv2_b, fc1_w, fc1_b, fc2_w, fc2_b = params
    B = x_nchw.shape[0]
    nf = conv1_w.shape[0]
    nf2 = conv2_w.shape[0]
    fc1 = fc1_w.shape[0]
    n_pix = H * W          # 16 input pixels
    n_out = 3 * 3          # 9 conv2 output positions

    x = x_nchw[:, 0, :, :].astype(jnp.float32).reshape(B, n_pix)             # row p = h*4 + w

    # ---- conv1: fold per-filter scale into the pixel-replication matrix ----
    # e_scaled[p, p'*NF + f] = (p == p') * w1[f]   -> h1 = relu(x @ e_scaled + b1_t)
    w1 = conv1_w.reshape(nf).astype(jnp.float32)
    e_scaled = jnp.kron(jnp.eye(n_pix, dtype=jnp.float32),
                        w1.reshape(1, nf))                                   # (16, 16*NF)
    b1_t = jnp.tile(conv1_b.astype(jnp.float32), n_pix).reshape(1, n_pix * nf)

    # ---- conv2: single im2col weight matrix (16*NF, 9*NF2) ----
    # W2[p*NF+f, q*NF2+g] = w2[g, f, ph-i, pw-j] for the unique valid (di,dj), else 0.
    sel = np.zeros((n_pix, n_out, 2, 2), np.float32)                         # static selector
    for i in range(3):
        for j in range(3):
            for di in range(2):
                for dj in range(2):
                    sel[(i + di) * W + (j + dj), i * 3 + j, di, dj] = 1.0
    sel = jnp.asarray(sel)
    w2 = conv2_w.astype(jnp.float32)                                         # (NF2, NF, 2, 2)
    w2_big = jnp.einsum('pqde,gfde->pfqg', sel, w2).reshape(n_pix * nf,
                                                            n_out * nf2)     # (256, 288)
    b2_t = jnp.tile(conv2_b.astype(jnp.float32), n_out).reshape(1, n_out * nf2)

    # ---- fc1: permute columns to the kernel's [(i*3+j)*NF2 + g] feature order ----
    # (PyTorch flatten order of (B, NF2, 3, 3) is g*9 + i*3 + j.)
    wfc1 = jnp.transpose(fc1_w.astype(jnp.float32).reshape(fc1, nf2, 3, 3),
                         (2, 3, 1, 0)).reshape(n_out * nf2, fc1)             # (288, FC1)
    bfc1 = fc1_b.astype(jnp.float32).reshape(1, fc1)
    wfc2 = fc2_w.astype(jnp.float32).T                                       # (FC1, 1)
    bfc2 = fc2_b.astype(jnp.float32).reshape(1, 1)

    # ---- batch tiling: pad B to a sublane/tile-friendly size, grid over batch ----
    TB = 256                                   # ~0.7 MiB activations/tile: fits any gen's VMEM
    Bp = _round_up(B, 8)
    if Bp > TB:
        Bp = _round_up(Bp, TB)
    else:
        TB = Bp
    if Bp != B:
        x = jnp.pad(x, ((0, Bp - B), (0, 0)))

    def _full(arr):                            # whole-array (un-tiled) weight block
        return pl.BlockSpec(arr.shape, lambda i: (0, 0))

    out = pl.pallas_call(
        tabular_cnn_kernel,
        out_shape=jax.ShapeDtypeStruct((Bp, 1), jnp.float32),
        grid=(Bp // TB,),
        in_specs=[
            pl.BlockSpec((TB, n_pix), lambda i: (i, 0)),
            _full(e_scaled), _full(b1_t), _full(w2_big), _full(b2_t),
            _full(wfc1), _full(bfc1), _full(wfc2), _full(bfc2),
        ],
        out_specs=pl.BlockSpec((TB, 1), lambda i: (i, 0)),
        compiler_params=pltpu.CompilerParams(
            dimension_semantics=("parallel",)),
    )(x, e_scaled, b1_t, w2_big, b2_t, wfc1, bfc1, wfc2, bfc2)
    return out[:B]


def reference_forward(x_nchw, params):
    """Pure-JAX replica of the PyTorch forward (NCHW semantics)."""
    conv1_w, conv1_b, conv2_w, conv2_b, fc1_w, fc1_b, fc2_w, fc2_b = params
    B = x_nchw.shape[0]
    x = x_nchw[:, 0]                                                         # (B, 4, 4)
    h1 = jax.nn.relu(x[:, None, :, :] * conv1_w.reshape(1, -1, 1, 1)
                     + conv1_b.reshape(1, -1, 1, 1))                         # (B, NF, 4, 4)
    out = jnp.zeros((B, conv2_w.shape[0], 3, 3), jnp.float32)
    for di in range(2):
        for dj in range(2):
            patch = h1[:, :, di:di + 3, dj:dj + 3]                           # (B, NF, 3, 3)
            out = out + jnp.einsum('bfij,gf->bgij', patch, conv2_w[:, :, di, dj])
    h2 = jax.nn.relu(out + conv2_b.reshape(1, -1, 1, 1))                     # (B, NF2, 3, 3)
    flat = h2.reshape(B, -1)                                                 # (B, 288)
    h3 = jax.nn.relu(flat @ fc1_w.T + fc1_b)
    return h3 @ fc2_w.T + fc2_b                                              # (B, 1)


if __name__ == "__main__":
    key = jax.random.PRNGKey(0)
    ks = jax.random.split(key, 9)
    B = 2
    x = jax.random.normal(ks[0], (B, 1, H, W), jnp.float32)

    conv1_w = jax.random.normal(ks[1], (NF, 1, 1, 1), jnp.float32) * 0.5
    conv1_b = jax.random.normal(ks[2], (NF,), jnp.float32) * 0.1
    conv2_w = jax.random.normal(ks[3], (NF2, NF, 2, 2), jnp.float32) * 0.2
    conv2_b = jax.random.normal(ks[4], (NF2,), jnp.float32) * 0.1
    fc1_w = jax.random.normal(ks[5], (FC1, NF2 * 3 * 3), jnp.float32) * 0.05
    fc1_b = jax.random.normal(ks[6], (FC1,), jnp.float32) * 0.1
    fc2_w = jax.random.normal(ks[7], (1, FC1), jnp.float32) * 0.1
    fc2_b = jax.random.normal(ks[8], (1,), jnp.float32) * 0.1
    params = (conv1_w, conv1_b, conv2_w, conv2_b, fc1_w, fc1_b, fc2_w, fc2_b)

    out = jax.block_until_ready(jax.jit(tabular_cnn_forward)(x, params))
    ref = jax.block_until_ready(reference_forward(x, params))

    assert out.shape == (B, 1), out.shape
    assert jnp.allclose(out, ref, rtol=1e-4, atol=1e-4), (out, ref)
    print("KERNEL_OK")
</pallas_src>

<mosaic_0001>
module attributes {stable_mosaic.version = 11 : i64} {
  func.func @tabular_cnn_kernel(%arg0: i32, %arg1: memref<8x16xf32, #tpu.memory_space<vmem>>, %arg2: memref<16x256xf32, #tpu.memory_space<vmem>>, %arg3: memref<1x256xf32, #tpu.memory_space<vmem>>, %arg4: memref<256x288xf32, #tpu.memory_space<vmem>>, %arg5: memref<1x288xf32, #tpu.memory_space<vmem>>, %arg6: memref<288x64xf32, #tpu.memory_space<vmem>>, %arg7: memref<1x64xf32, #tpu.memory_space<vmem>>, %arg8: memref<64x1xf32, #tpu.memory_space<vmem>>, %arg9: memref<1x1xf32, #tpu.memory_space<vmem>>, %arg10: memref<8x1xf32, #tpu.memory_space<vmem>>) attributes {dimension_semantics = [#tpu.dimension_semantics<parallel>], iteration_bounds = array<i64: 1>, scalar_prefetch = 0 : i64, scratch_operands = 0 : i64, tpu.core_type = #tpu.core_type<tc>, window_params = [{transform_indices = @transform_0, window_bounds = array<i64: 8, 16>}, {pipeline_mode = #tpu.pipeline_mode<synchronous>, transform_indices = @transform_1, window_bounds = array<i64: 16, 256>}, {pipeline_mode = #tpu.pipeline_mode<synchronous>, transform_indices = @transform_2, window_bounds = array<i64: 1, 256>}, {pipeline_mode = #tpu.pipeline_mode<synchronous>, transform_indices = @transform_3, window_bounds = array<i64: 256, 288>}, {pipeline_mode = #tpu.pipeline_mode<synchronous>, transform_indices = @transform_4, window_bounds = array<i64: 1, 288>}, {pipeline_mode = #tpu.pipeline_mode<synchronous>, transform_indices = @transform_5, window_bounds = array<i64: 288, 64>}, {pipeline_mode = #tpu.pipeline_mode<synchronous>, transform_indices = @transform_6, window_bounds = array<i64: 1, 64>}, {pipeline_mode = #tpu.pipeline_mode<synchronous>, transform_indices = @transform_7, window_bounds = array<i64: 64, 1>}, {pipeline_mode = #tpu.pipeline_mode<synchronous>, transform_indices = @transform_8, window_bounds = array<i64: 1, 1>}, {transform_indices = @transform_9, window_bounds = array<i64: 8, 1>}]} {
    %c0 = arith.constant 0 : index
    %c0_0 = arith.constant 0 : index
    %0 = vector.load %arg1[%c0, %c0_0] : memref<8x16xf32, #tpu.memory_space<vmem>>, vector<8x16xf32>
    %c0_1 = arith.constant 0 : index
    %c0_2 = arith.constant 0 : index
    %1 = vector.load %arg2[%c0_1, %c0_2] : memref<16x256xf32, #tpu.memory_space<vmem>>, vector<16x256xf32>
    %cst = arith.constant dense<0.000000e+00> : vector<8x256xf32>
    %2 = tpu.matmul %0, %1, %cst {dimension_numbers = #tpu.dot_dimension_numbers<[1], [0], [0], [1], [0, 0, 1, 1], [], []>} : vector<8x16xf32>, vector<16x256xf32>, vector<8x256xf32> -> vector<8x256xf32>
    %c0_3 = arith.constant 0 : index
    %c0_4 = arith.constant 0 : index
    %3 = vector.load %arg3[%c0_3, %c0_4] : memref<1x256xf32, #tpu.memory_space<vmem>>, vector<1x256xf32>
    %4 = vector.broadcast %3 : vector<1x256xf32> to vector<8x256xf32>
    %5 = arith.addf %2, %4 : vector<8x256xf32>
    %cst_5 = arith.constant 0.000000e+00 : f32
    %6 = vector.broadcast %cst_5 : f32 to vector<8x256xf32>
    %7 = arith.maximumf %5, %6 : vector<8x256xf32>
    %c0_6 = arith.constant 0 : index
    %c0_7 = arith.constant 0 : index
    %8 = vector.load %arg4[%c0_6, %c0_7] : memref<256x288xf32, #tpu.memory_space<vmem>>, vector<256x288xf32>
    %cst_8 = arith.constant dense<0.000000e+00> : vector<8x288xf32>
    %9 = tpu.matmul %7, %8, %cst_8 {dimension_numbers = #tpu.dot_dimension_numbers<[1], [0], [0], [1], [0, 0, 1, 1], [], []>} : vector<8x256xf32>, vector<256x288xf32>, vector<8x288xf32> -> vector<8x288xf32>
    %c0_9 = arith.constant 0 : index
    %c0_10 = arith.constant 0 : index
    %10 = vector.load %arg5[%c0_9, %c0_10] : memref<1x288xf32, #tpu.memory_space<vmem>>, vector<1x288xf32>
    %11 = vector.broadcast %10 : vector<1x288xf32> to vector<8x288xf32>
    %12 = arith.addf %9, %11 : vector<8x288xf32>
    %cst_11 = arith.constant 0.000000e+00 : f32
    %13 = vector.broadcast %cst_11 : f32 to vector<8x288xf32>
    %14 = arith.maximumf %12, %13 : vector<8x288xf32>
    %c0_12 = arith.constant 0 : index
    %c0_13 = arith.constant 0 : index
    %15 = vector.load %arg6[%c0_12, %c0_13] : memref<288x64xf32, #tpu.memory_space<vmem>>, vector<288x64xf32>
    %cst_14 = arith.constant dense<0.000000e+00> : vector<8x64xf32>
    %16 = tpu.matmul %14, %15, %cst_14 {dimension_numbers = #tpu.dot_dimension_numbers<[1], [0], [0], [1], [0, 0, 1, 1], [], []>} : vector<8x288xf32>, vector<288x64xf32>, vector<8x64xf32> -> vector<8x64xf32>
    %c0_15 = arith.constant 0 : index
    %c0_16 = arith.constant 0 : index
    %17 = vector.load %arg7[%c0_15, %c0_16] : memref<1x64xf32, #tpu.memory_space<vmem>>, vector<1x64xf32>
    %18 = vector.broadcast %17 : vector<1x64xf32> to vector<8x64xf32>
    %19 = arith.addf %16, %18 : vector<8x64xf32>
    %cst_17 = arith.constant 0.000000e+00 : f32
    %20 = vector.broadcast %cst_17 : f32 to vector<8x64xf32>
    %21 = arith.maximumf %19, %20 : vector<8x64xf32>
    %c0_18 = arith.constant 0 : index
    %c0_19 = arith.constant 0 : index
    %22 = vector.load %arg8[%c0_18, %c0_19] : memref<64x1xf32, #tpu.memory_space<vmem>>, vector<64x1xf32>
    %cst_20 = arith.constant dense<0.000000e+00> : vector<8x1xf32>
    %23 = tpu.matmul %21, %22, %cst_20 {dimension_numbers = #tpu.dot_dimension_numbers<[1], [0], [0], [1], [0, 0, 1, 1], [], []>} : vector<8x64xf32>, vector<64x1xf32>, vector<8x1xf32> -> vector<8x1xf32>
    %c0_21 = arith.constant 0 : index
    %c0_22 = arith.constant 0 : index
    %24 = vector.load %arg9[%c0_21, %c0_22] : memref<1x1xf32, #tpu.memory_space<vmem>>, vector<1x1xf32>
    %25 = vector.broadcast %24 : vector<1x1xf32> to vector<8x1xf32>
    %26 = arith.addf %23, %25 : vector<8x1xf32>
    %c0_23 = arith.constant 0 : index
    %c0_24 = arith.constant 0 : index
    %27 = vector.load %arg10[%c0_23, %c0_24] : memref<8x1xf32, #tpu.memory_space<vmem>>, vector<8x1xf32>
    tpu.vector_store %arg10[%c0_23, %c0_24], %26 {strides = array<i32>} : memref<8x1xf32, #tpu.memory_space<vmem>>, vector<8x1xf32>,
    return
  }
  func.func @transform_0(%arg0: i32) -> (i32, i32) {
    %c0_i32 = arith.constant 0 : i32
    %c0_i32_0 = arith.constant 0 : i32
    return %arg0, %c0_i32 : i32, i32
  }
  func.func @transform_1(%arg0: i32) -> (i32, i32) {
    %c0_i32 = arith.constant 0 : i32
    %c0_i32_0 = arith.constant 0 : i32
    %c0_i32_1 = arith.constant 0 : i32
    return %c0_i32, %c0_i32_0 : i32, i32
  }
  func.func @transform_2(%arg0: i32) -> (i32, i32) {
    %c0_i32 = arith.constant 0 : i32
    %c0_i32_0 = arith.constant 0 : i32
    %c0_i32_1 = arith.constant 0 : i32
    return %c0_i32, %c0_i32_0 : i32, i32
  }
  func.func @transform_3(%arg0: i32) -> (i32, i32) {
    %c0_i32 = arith.constant 0 : i32
    %c0_i32_0 = arith.constant 0 : i32
    %c0_i32_1 = arith.constant 0 : i32
    return %c0_i32, %c0_i32_0 : i32, i32
  }
  func.func @transform_4(%arg0: i32) -> (i32, i32) {
    %c0_i32 = arith.constant 0 : i32
    %c0_i32_0 = arith.constant 0 : i32
    %c0_i32_1 = arith.constant 0 : i32
    return %c0_i32, %c0_i32_0 : i32, i32
  }
  func.func @transform_5(%arg0: i32) -> (i32, i32) {
    %c0_i32 = arith.constant 0 : i32
    %c0_i32_0 = arith.constant 0 : i32
    %c0_i32_1 = arith.constant 0 : i32
    return %c0_i32, %c0_i32_0 : i32, i32
  }
  func.func @transform_6(%arg0: i32) -> (i32, i32) {
    %c0_i32 = arith.constant 0 : i32
    %c0_i32_0 = arith.constant 0 : i32
    %c0_i32_1 = arith.constant 0 : i32
    return %c0_i32, %c0_i32_0 : i32, i32
  }
  func.func @transform_7(%arg0: i32) -> (i32, i32) {
    %c0_i32 = arith.constant 0 : i32
    %c0_i32_0 = arith.constant 0 : i32
    %c0_i32_1 = arith.constant 0 : i32
    return %c0_i32, %c0_i32_0 : i32, i32
  }
  func.func @transform_8(%arg0: i32) -> (i32, i32) {
    %c0_i32 = arith.constant 0 : i32
    %c0_i32_0 = arith.constant 0 : i32
    %c0_i32_1 = arith.constant 0 : i32
    return %c0_i32, %c0_i32_0 : i32, i32
  }
  func.func @transform_9(%arg0: i32) -> (i32, i32) {
    %c0_i32 = arith.constant 0 : i32
    %c0_i32_0 = arith.constant 0 : i32
    return %arg0, %c0_i32 : i32, i32
  }
}

</mosaic_0001>

<bundles_post_ra>
// kernel: tile.18
= control target key start
LH: loop header
LB: loop body
LE: loop exit
PB: predicated region body
PF: predicated region fallthrough
CT: control target
= control target key end

     0   :  { %s28_s0 = inlined_call_operand.vmem [shape: f32[32], index: 0, kind: input, shape index: {}]   ;;  %s29_s1 = inlined_call_operand.vmem [shape: f32[9,32], index: 1, kind: output, shape index: {}]  }
   0x1   :  { %v4_v0 = vld [vmem:[%s28_s0] ss:$0 sm:$0xff] }
   0x2   :  { %5 = vst [vmem:[%s29_s1] sm:$0xff] %v4_v0  ;;  %8 = vst [vmem:[%s29_s1 + $0x8] sm:$0xff] %v4_v0 }

// kernel: tile.19
= control target key start
LH: loop header
LB: loop body
LE: loop exit
PB: predicated region body
PF: predicated region fallthrough
CT: control target
= control target key end

     0   :  { %s6_s6 = smov 3  ;;  %s13_s11 = smov 3  ;;  %vm3_vm0 = vcmask 261120   ;;  %vm10_vm1 = vcmask 1048320   ;;  %vm17_vm2 = vcmask 785920   ;;  %vm24_vm3 = vcmask 523520   ;;  %s90_s0 = inlined_call_operand.vmem [shape: f32[9,32], index: 0, kind: input, shape index: {}]   ;;  %s91_s1 = inlined_call_operand.vmem [shape: f32[1,288], index: 1, kind: output, shape index: {}]  }
   0x1   :  { %v2_v0 = vld [vmem:[%s90_s0] ss:$4 sm:$0x7]   ;;  %v48_v1 = vld [vmem:[%s90_s0 + $0x3] ss:$4 sm:%s6_s6]   ;;  %s56_s12 = smov 96  }
   0x2   :  { %8 = vrot.lane.b32.xlu0 %v48_v1, %s56_s12  ;;  %s20_s13 = smov 3  ;;  %4 = vst.msk [vmem:[#allocation0] ss:$8 sm:$0x7] %vm3_vm0, %v2_v0   ;;  %v49_v2 = vld [vmem:[%s90_s0 + $0x2] ss:$4 sm:%s13_s11]  }
   0x3   :  { %v50_v3 = vld [vmem:[%s90_s0 + $0x1] ss:$4 sm:%s20_s13]   ;;  %s57_s0 = smov 32   ;;  %s58_s18 = smov 64  }
   0x4   :  { %22 = vrot.lane.b32.xlu1 %v50_v3, %s57_s0 }
   0x6   :  { %15 = vrot.lane.b32.xlu0 %v49_v2, %s58_s18 }
   0x9   :  { %v41_v4 = vld [vmem:[#allocation0 + $0x10] sm:$0x1] }
   0xa   :  { %52 = vst [vmem:[%s91_s1 + $0x2] sm:$0x1] %v41_v4 }
  0x74   :  { %v9_v5 = vpop.permute.xlu0 %8  }
  0x75   :  { %11 = vst.msk [vmem:[#allocation0] ss:$8 sm:$0x3] %vm10_vm1, %v9_v5  }
  0x76   :  { %v23_v6 = vpop.permute.xlu1 %22  }
  0x78   :  { %v16_v7 = vpop.permute.xlu0 %15  }
  0x79   :  { %18 = vst.msk [vmem:[#allocation0] ss:$8 sm:$0x3] %vm17_vm2, %v16_v7  }
  0x7a   :  { %25 = vst.msk [vmem:[#allocation0] ss:$8 sm:$0x3] %vm24_vm3, %v23_v6  }
  0x81   :  { %v30_v8 = vld [vmem:[#allocation0] sm:$0x1]  ;;  %v35_v9 = vld [vmem:[#allocation0 + $0x8] sm:$0x1] }
  0x82   :  { %33 = vst [vmem:[%s91_s1] sm:$0x1] %v30_v8  ;;  %51 = vst [vmem:[%s91_s1 + $0x1] sm:$0x1] %v35_v9 }

// kernel: tile.14
= control target key start
LH: loop header
LB: loop body
LE: loop exit
PB: predicated region body
PF: predicated region fallthrough
CT: control target
= control target key end

     0   :  { %s7_s6 = smov 3  ;;  %s21_s9 = smov 3  ;;  %vm4_vm0 = vcmask 130048   ;;  %vm11_vm1 = vcmask 1048448   ;;  %vm18_vm2 = vcmask 917248   ;;  %vm25_vm3 = vcmask 786048   ;;  %s131_s0 = inlined_call_operand.vmem [shape: f32[16,16], index: 0, kind: input, shape index: {}]   ;;  %s132_s1 = inlined_call_operand.vmem [shape: f32[1,256], index: 1, kind: output, shape index: {}]  }
   0x1   :  { %v69_v0 = vld [vmem:[%s131_s0 + $0x7] ss:$8 sm:%s7_s6]   ;;  %s84_s10 = smov 112   ;;  %v71_v1 = vld [vmem:[%s131_s0 + $0x5] ss:$8 sm:%s21_s9]   ;;  %s14_s13 = smov 3 }
   0x2   :  { %9 = vrot.lane.b32.xlu0 %v69_v0, %s84_s10  ;;  %s85_s14 = smov 80   ;;  %v70_v2 = vld [vmem:[%s131_s0 + $0x6] ss:$8 sm:%s14_s13]   ;;  %s28_s17 = smov 3  ;;  %vm32_vm4 = vcmask 654848   ;;  %vm39_vm5 = vcmask 523648  }
   0x3   :  { %23 = vrot.lane.b32.xlu1 %v71_v1, %s85_s14  ;;  %v72_v3 = vld [vmem:[%s131_s0 + $0x4] ss:$8 sm:%s28_s17]   ;;  %s35_s20 = smov 3  ;;  %s42_s21 = smov 3  ;;  %vm46_vm6 = vcmask 392448   ;;  %vm53_vm7 = vcmask 261248  }
   0x4   :  { %s86_s22 = smov 96   ;;  %s87_s23 = smov 64   ;;  %v73_v4 = vld [vmem:[%s131_s0 + $0x3] ss:$8 sm:%s35_s20]   ;;  %v74_v5 = vld [vmem:[%s131_s0 + $0x2] ss:$8 sm:%s42_s21]  }
   0x5   :  { %s2_s26 = smov 3  ;;  %s49_s29 = smov 3 }
   0x6   :  { %16 = vrot.lane.b32.xlu0 %v70_v2, %s86_s22  ;;  %v3_v6 = vld [vmem:[%s131_s0] ss:$8 sm:%s2_s26]   ;;  %s88_s3 = smov 48   ;;  %s89_s4 = smov 32  }
   0x7   :  { %30 = vrot.lane.b32.xlu1 %v72_v3, %s87_s23  ;;  %5 = vst.msk [vmem:[#allocation0] ss:$8 sm:$0x3] %vm4_vm0, %v3_v6   ;;  %v75_v7 = vld [vmem:[%s131_s0 + $0x1] ss:$8 sm:%s49_s29]   ;;  %s90_s0 = smov 16  }
   0xa   :  { %37 = vrot.lane.b32.xlu0 %v73_v4, %s88_s3 }
   0xb   :  { %44 = vrot.lane.b32.xlu1 %v74_v5, %s89_s4 }
   0xe   :  { %51 = vrot.lane.b32.xlu0 %v75_v7, %s90_s0 }
  0x74   :  { %v10_v8 = vpop.permute.xlu0 %9  }
  0x75   :  { %12 = vst.msk [vmem:[#allocation0] ss:$8 sm:$0x3] %vm11_vm1, %v10_v8   ;;  %v24_v9 = vpop.permute.xlu1 %23  }
  0x78   :  { %v17_v10 = vpop.permute.xlu0 %16  }
  0x79   :  { %19 = vst.msk [vmem:[#allocation0] ss:$8 sm:$0x3] %vm18_vm2, %v17_v10   ;;  %v31_v11 = vpop.permute.xlu1 %30  }
  0x7a   :  { %26 = vst.msk [vmem:[#allocation0] ss:$8 sm:$0x3] %vm25_vm3, %v24_v9  }
  0x7b   :  { %33 = vst.msk [vmem:[#allocation0] ss:$8 sm:$0x3] %vm32_vm4, %v31_v11  }
  0x7c   :  { %v38_v12 = vpop.permute.xlu0 %37  }
  0x7d   :  { %40 = vst.msk [vmem:[#allocation0] ss:$8 sm:$0x3] %vm39_vm5, %v38_v12   ;;  %v45_v13 = vpop.permute.xlu1 %44  }
  0x7e   :  { %47 = vst.msk [vmem:[#allocation0] ss:$8 sm:$0x3] %vm46_vm6, %v45_v13  }
  0x80   :  { %v52_v14 = vpop.permute.xlu0 %51  }
  0x81   :  { %54 = vst.msk [vmem:[#allocation0] ss:$8 sm:$0x3] %vm53_vm7, %v52_v14  }
  0x88   :  { %v59_v15 = vld [vmem:[#allocation0] sm:$0x1]  ;;  %v64_v16 = vld [vmem:[#allocation0 + $0x8] sm:$0x1] }
  0x89   :  { %62 = vst [vmem:[%s132_s1] sm:$0x1] %v59_v15  ;;  %76 = vst [vmem:[%s132_s1 + $0x1] sm:$0x1] %v64_v16 }

// kernel: squeeze.1
= control target key start
LH: loop header
LB: loop body
LE: loop exit
PB: predicated region body
PF: predicated region fallthrough
CT: control target
= control target key end

     0   :  { %s30_s10 = smov 3  ;;  %s11_s11 = smov 3  ;;  %vm13_vm0 = vcmask 31744   ;;  %vm20_vm1 = vcmask 130144   ;;  %vm27_vm2 = vcmask 97344   ;;  %vm34_vm3 = vcmask 64544   ;;  %s70_s0 = inlined_call_operand.vmem [shape: f32[2,1,4,4], index: 0, kind: input, shape index: {}]   ;;  %s71_s1 = inlined_call_operand.vmem [shape: f32[2,16], index: 1, kind: output, shape index: {}]  }
   0x1   :  { %v44_v0 = vld [vmem:[%s70_s0 + $0x4] sm:$0xf]  ;;  %v9_v1 = vld [vmem:[%s70_s0] sm:$0xf]  ;;  %s16_s0 = smov 3  ;;  %s23_s12 = smov 3 }
   0x2   :  { %8 = vst [vmem:[#allocation1 + $0x8] sm:$0xf] %v44_v0  ;;  %10 = vst [vmem:[#allocation1] sm:$0xf] %v9_v1  ;;  %s48_s13 = smov 12   ;;  %s49_s14 = smov 4  }
   0x3   :  { %s50_s15 = smov 8  }
   0x9   :  { %v17_v2 = vld [vmem:[#allocation1 + $0x3] ss:$8 sm:%s16_s0]   ;;  %v31_v3 = vld [vmem:[#allocation1 + $0x1] ss:$8 sm:%s30_s10]   ;;  %v12_v4 = vld [vmem:[#allocation1] ss:$8 sm:%s11_s11]  }
   0xa   :  { %18 = vrot.lane.b32.xlu0 %v17_v2, %s48_s13  ;;  %32 = vrot.lane.b32.xlu1 %v31_v3, %s49_s14  ;;  %v24_v5 = vld [vmem:[#allocation1 + $0x2] ss:$8 sm:%s23_s12]   ;;  %14 = vst.msk [vmem:[#allocation0] sm:$0x3] %vm13_vm0, %v12_v4  }
   0xe   :  { %25 = vrot.lane.b32.xlu0 %v24_v5, %s50_s15 }
  0x7c   :  { %v19_v6 = vpop.permute.xlu0 %18   ;;  %v33_v7 = vpop.permute.xlu1 %32  }
  0x7d   :  { %21 = vst.msk [vmem:[#allocation0] sm:$0x3] %vm20_vm1, %v19_v6  }
  0x80   :  { %v26_v8 = vpop.permute.xlu0 %25  }
  0x81   :  { %28 = vst.msk [vmem:[#allocation0] sm:$0x3] %vm27_vm2, %v26_v8  }
  0x82   :  { %35 = vst.msk [vmem:[#allocation0] sm:$0x3] %vm34_vm3, %v33_v7  }
  0x89   :  { %v40_v9 = vld [vmem:[#allocation0] sm:$0x3] }
  0x8a   :  { %43 = vst [vmem:[%s71_s1] sm:$0x3] %v40_v9 }

// kernel: tabular_cnn_forward.1
= control target key start
LH: loop header
LB: loop body
LE: loop exit
PB: predicated region body
PF: predicated region fallthrough
CT: control target
= control target key end

     0   :  { %v789_v3 = vmov 0.0   ;;  %vm51_vm0 = vcmask 130048   ;;  %vm790_vm1 = vmmov 0   ;;  %vm428_vm2 = vcmask 261120   ;;  %s1321_s1 = inlined_call_operand.vmem [shape: f32[16,256], index: 1, kind: input, shape index: {}]   ;;  %s1322_s0 = inlined_call_operand.vmem [shape: f32[8,16], index: 0, kind: input, shape index: {}]   ;;  %s1323_s3 = inlined_call_operand.vmem [shape: f32[256,288], index: 3, kind: input, shape index: {}]   ;;  %s1324_s5 = inlined_call_operand.vmem [shape: f32[288,64], index: 5, kind: input, shape index: {}]   ;;  %s1325_s2 = inlined_call_operand.vmem [shape: f32[1,256], index: 2, kind: input, shape index: {}]   ;;  %s1326_s4 = inlined_call_operand.vmem [shape: f32[1,288], index: 4, kind: input, shape index: {}]   ;;  %s1327_s7 = inlined_call_operand.vmem [shape: f32[64,1], index: 7, kind: input, shape index: {}]   ;;  %s1328_s8 = inlined_call_operand.<no memory space> [shape: f32[1,1], index: 8, kind: input, shape index: {}]   ;;  %s1329_s6 = inlined_call_operand.vmem [shape: f32[1,64], index: 6, kind: input, shape index: {}]   ;;  %s1330_s9 = inlined_call_operand.vmem [shape: f32[8,1], index: 9, kind: output, shape index: {}]  }
   0x1   :  { %v38_v0 = vld [vmem:[%s1321_s1 + $0x18] sm:$0xff]  ;;  %v37_v1 = vld [vmem:[%s1321_s1 + $0x10] sm:$0xff]  ;;  %v36_v2 = vld [vmem:[%s1321_s1 + $0x8] sm:$0xff]  ;;  %119 = vmatprep.mubr.f32.mxu1 %v789_v3  ;;  %vm588_vm3 = vcmask 523264   ;;  %vm662_vm4 = vcmask 7168  }
   0x2   :  { %83 = vmatprep.subr.mxu1 %v38_v0  ;;  %v35_v4 = vld [vmem:[%s1321_s1] sm:$0xff]  ;;  %v174_v6 = vld [vmem:[%s1323_s3 + $0x170] sm:$0xff]  ;;  %v173_v7 = vld [vmem:[%s1323_s3 + $0x168] sm:$0xff] }
   0x3   :  { %84 = vmatpush1.msra.mxu1 %v37_v1  ;;  %v34_v5 = vld [vmem:[%s1322_s0] sm:$0xff]  ;;  %v171_v8 = vld [vmem:[%s1323_s3 + $0x158] sm:$0xff]  ;;  %v170_v9 = vld [vmem:[%s1323_s3 + $0x150] sm:$0xff] }
   0x4   :  { %85 = vmatprep.subr.mxu1 %v36_v2  ;;  %v168_v10 = vld [vmem:[%s1323_s3 + $0x140] sm:$0xff]  ;;  %v167_v11 = vld [vmem:[%s1323_s3 + $0x138] sm:$0xff]  ;;  %v165_v12 = vld [vmem:[%s1323_s3 + $0x128] sm:$0xff] }
   0x5   :  { %86 = vmatpush1.msra.mxu1 %v35_v4  ;;  %v164_v13 = vld [vmem:[%s1323_s3 + $0x120] sm:$0xff]  ;;  %v162_v14 = vld [vmem:[%s1323_s3 + $0x110] sm:$0xff]  ;;  %v161_v15 = vld [vmem:[%s1323_s3 + $0x108] sm:$0xff] }
   0x6   :  { %668 = vmatmul.mubr.msk.f32.vlgmr.msra.gmra.mxu1 %vm51_vm0, %v34_v5  ;;  %241 = vmatprep.subr.mxu1 %v174_v6  ;;  %v159_v16 = vld [vmem:[%s1323_s3 + $0xf8] sm:$0xff]  ;;  %v158_v18 = vld [vmem:[%s1323_s3 + $0xf0] sm:$0xff]  ;;  %v156_v20 = vld [vmem:[%s1323_s3 + $0xe0] sm:$0xff] }
   0x7   :  { %242 = vmatpush1.msra.mxu1 %v173_v7  ;;  %v223_v17 = vld [vmem:[%s1323_s3 + $0x2f8] sm:$0xff]  ;;  %v220_v21 = vld [vmem:[%s1323_s3 + $0x2e0] sm:$0xff]  ;;  %v217_v24 = vld [vmem:[%s1323_s3 + $0x2c8] sm:$0xff] }
   0x8   :  { %243 = vmatprep.subr.mxu1 %v171_v8  ;;  %673 = vmatprep.subr.mxu0 %v223_v17  ;;  %v175_v19 = vld [vmem:[%s1323_s3 + $0x178] sm:$0xff]  ;;  %v172_v22 = vld [vmem:[%s1323_s3 + $0x160] sm:$0xff]  ;;  %v153_v25 = vld [vmem:[%s1323_s3 + $0xc8] sm:$0xff] }
   0x9   :  { %244 = vmatpush1.msra.mxu1 %v170_v9  ;;  %674 = vmatpush3.msra.mxu0 %v175_v19  ;;  %v155_v23 = vld [vmem:[%s1323_s3 + $0xd8] sm:$0xff]  ;;  %v169_v26 = vld [vmem:[%s1323_s3 + $0x148] sm:$0xff]  ;;  %v214_v27 = vld [vmem:[%s1323_s3 + $0x2b0] sm:$0xff] }
   0xa   :  { %245 = vmatprep.subr.mxu1 %v168_v10  ;;  %675 = vmatprep.subr.mxu0 %v220_v21  ;;  %v152_v28 = vld [vmem:[%s1323_s3 + $0xc0] sm:$0xff]  ;;  %v166_v29 = vld [vmem:[%s1323_s3 + $0x130] sm:$0xff]  ;;  %v211_v31 = vld [vmem:[%s1323_s3 + $0x298] sm:$0xff] }
   0xb   :  { %246 = vmatpush1.msra.mxu1 %v167_v11  ;;  %676 = vmatpush3.msra.mxu0 %v172_v22  ;;  %v150_v30 = vld [vmem:[%s1323_s3 + $0xb0] sm:$0xff]  ;;  %v149_v32 = vld [vmem:[%s1323_s3 + $0xa8] sm:$0xff]  ;;  %v163_v33 = vld [vmem:[%s1323_s3 + $0x118] sm:$0xff] }
   0xc   :  { %247 = vmatprep.subr.mxu1 %v165_v12  ;;  %677 = vmatprep.subr.mxu0 %v217_v24  ;;  %v147_v34 = vld [vmem:[%s1323_s3 + $0x98] sm:$0xff]  ;;  %v208_v35 = vld [vmem:[%s1323_s3 + $0x280] sm:$0xff]  ;;  %v146_v36 = vld [vmem:[%s1323_s3 + $0x90] sm:$0xff] }
   0xd   :  { %248 = vmatpush1.msra.mxu1 %v164_v13  ;;  %678 = vmatpush3.msra.mxu0 %v169_v26  ;;  %v160_v37 = vld [vmem:[%s1323_s3 + $0x100] sm:$0xff]  ;;  %v205_v39 = vld [vmem:[%s1323_s3 + $0x268] sm:$0xff]  ;;  %v143_v40 = vld [vmem:[%s1323_s3 + $0x78] sm:$0xff] }
   0xe   :  { %249 = vmatprep.subr.mxu1 %v162_v14  ;;  %679 = vmatprep.subr.mxu0 %v214_v27  ;;  %v144_v38 = vld [vmem:[%s1323_s3 + $0x80] sm:$0xff]  ;;  %v157_v41 = vld [vmem:[%s1323_s3 + $0xe8] sm:$0xff]  ;;  %v202_v43 = vld [vmem:[%s1323_s3 + $0x250] sm:$0xff] }
   0xf   :  { %250 = vmatpush1.msra.mxu1 %v161_v15  ;;  %680 = vmatpush3.msra.mxu0 %v166_v29  ;;  %v141_v42 = vld [vmem:[%s1323_s3 + $0x68] sm:$0xff]  ;;  %v140_v44 = vld [vmem:[%s1323_s3 + $0x60] sm:$0xff]  ;;  %v154_v45 = vld [vmem:[%s1323_s3 + $0xd0] sm:$0xff] }
  0x10   :  { %251 = vmatprep.subr.mxu1 %v159_v16  ;;  %681 = vmatprep.subr.mxu0 %v211_v31  ;;  %v138_v46 = vld [vmem:[%s1323_s3 + $0x50] sm:$0xff]  ;;  %v199_v47 = vld [vmem:[%s1323_s3 + $0x238] sm:$0xff]  ;;  %v137_v48 = vld [vmem:[%s1323_s3 + $0x48] sm:$0xff] }
  0x11   :  { %252 = vmatpush1.msra.mxu1 %v158_v18  ;;  %682 = vmatpush3.msra.mxu0 %v163_v33  ;;  %v151_v49 = vld [vmem:[%s1323_s3 + $0xb8] sm:$0xff]  ;;  %v196_v51 = vld [vmem:[%s1323_s3 + $0x220] sm:$0xff]  ;;  %v134_v52 = vld [vmem:[%s1323_s3 + $0x30] sm:$0xff] }
  0x12   :  { %253 = vmatprep.subr.mxu1 %v156_v20  ;;  %683 = vmatprep.subr.mxu0 %v208_v35  ;;  %v135_v50 = vld [vmem:[%s1323_s3 + $0x38] sm:$0xff]  ;;  %v148_v53 = vld [vmem:[%s1323_s3 + $0xa0] sm:$0xff]  ;;  %v193_v55 = vld [vmem:[%s1323_s3 + $0x208] sm:$0xff] }
  0x13   :  { %254 = vmatpush1.msra.mxu1 %v155_v23  ;;  %684 = vmatpush3.msra.mxu0 %v160_v37  ;;  %v132_v54 = vld [vmem:[%s1323_s3 + $0x20] sm:$0xff]  ;;  %v131_v56 = vld [vmem:[%s1323_s3 + $0x18] sm:$0xff]  ;;  %v145_v57 = vld [vmem:[%s1323_s3 + $0x88] sm:$0xff] }
  0x14   :  { %255 = vmatprep.subr.mxu1 %v153_v25  ;;  %685 = vmatprep.subr.mxu0 %v205_v39  ;;  %v129_v58 = vld [vmem:[%s1323_s3 + $0x8] sm:$0xff]  ;;  %v190_v59 = vld [vmem:[%s1323_s3 + $0x1f0] sm:$0xff]  ;;  %v128_v60 = vld [vmem:[%s1323_s3] sm:$0xff] }
  0x15   :  { %256 = vmatpush1.msra.mxu1 %v152_v28  ;;  %686 = vmatpush3.msra.mxu0 %v157_v41  ;;  %v142_v61 = vld [vmem:[%s1323_s3 + $0x70] sm:$0xff]  ;;  %v221_v63 = vld [vmem:[%s1323_s3 + $0x2e8] sm:$0xff]  ;;  %v219_v0 = vld [vmem:[%s1323_s3 + $0x2d8] sm:$0xff] }
  0x16   :  { %257 = vmatprep.subr.mxu1 %v150_v30  ;;  %687 = vmatprep.subr.mxu0 %v202_v43  ;;  %v222_v62 = vld [vmem:[%s1323_s3 + $0x2f0] sm:$0xff]  ;;  %v216_v2 = vld [vmem:[%s1323_s3 + $0x2c0] sm:$0xff]  ;;  %v215_v4 = vld [vmem:[%s1323_s3 + $0x2b8] sm:$0xff] }
  0x17   :  { %258 = vmatpush1.msra.mxu1 %v149_v32  ;;  %688 = vmatpush3.msra.mxu0 %v154_v45  ;;  %v218_v1 = vld [vmem:[%s1323_s3 + $0x2d0] sm:$0xff]  ;;  %v213_v5 = vld [vmem:[%s1323_s3 + $0x2a8] sm:$0xff]  ;;  %v212_v6 = vld [vmem:[%s1323_s3 + $0x2a0] sm:$0xff] }
  0x18   :  { %259 = vmatprep.subr.mxu1 %v147_v34  ;;  %689 = vmatprep.subr.mxu0 %v199_v47  ;;  %v210_v7 = vld [vmem:[%s1323_s3 + $0x290] sm:$0xff]  ;;  %v209_v8 = vld [vmem:[%s1323_s3 + $0x288] sm:$0xff]  ;;  %v207_v9 = vld [vmem:[%s1323_s3 + $0x278] sm:$0xff] }
  0x19   :  { %260 = vmatpush1.msra.mxu1 %v146_v36  ;;  %690 = vmatpush3.msra.mxu0 %v151_v49  ;;  %v206_v10 = vld [vmem:[%s1323_s3 + $0x270] sm:$0xff]  ;;  %v204_v11 = vld [vmem:[%s1323_s3 + $0x260] sm:$0xff]  ;;  %v203_v12 = vld [vmem:[%s1323_s3 + $0x258] sm:$0xff] }
  0x1a   :  { %261 = vmatprep.subr.mxu1 %v144_v38  ;;  %691 = vmatprep.subr.mxu0 %v196_v51  ;;  %v201_v13 = vld [vmem:[%s1323_s3 + $0x248] sm:$0xff]  ;;  %v200_v14 = vld [vmem:[%s1323_s3 + $0x240] sm:$0xff]  ;;  %v198_v15 = vld [vmem:[%s1323_s3 + $0x230] sm:$0xff] }
  0x1b   :  { %262 = vmatpush1.msra.mxu1 %v143_v40  ;;  %692 = vmatpush3.msra.mxu0 %v148_v53  ;;  %v197_v16 = vld [vmem:[%s1323_s3 + $0x228] sm:$0xff]  ;;  %v195_v17 = vld [vmem:[%s1323_s3 + $0x218] sm:$0xff]  ;;  %v194_v18 = vld [vmem:[%s1323_s3 + $0x210] sm:$0xff]  ;;  %v41_v40 = vlaneseq }
  0x1c   :  { %263 = vmatprep.subr.mxu1 %v141_v42  ;;  %693 = vmatprep.subr.mxu0 %v193_v55  ;;  %v192_v19 = vld [vmem:[%s1323_s3 + $0x200] sm:$0xff]  ;;  %v191_v20 = vld [vmem:[%s1323_s3 + $0x1f8] sm:$0xff]  ;;  %v189_v21 = vld [vmem:[%s1323_s3 + $0x1e8] sm:$0xff] }
  0x1d   :  { %264 = vmatpush1.msra.mxu1 %v140_v44  ;;  %694 = vmatpush3.msra.mxu0 %v145_v57  ;;  %v188_v22 = vld [vmem:[%s1323_s3 + $0x1e0] sm:$0xff]  ;;  %v186_v23 = vld [vmem:[%s1323_s3 + $0x1d0] sm:$0xff]  ;;  %v187_v24 = vld [vmem:[%s1323_s3 + $0x1d8] sm:$0xff]  ;;  %v1149_v41 = vshrl.u32 %v41_v40, 7 }
  0x1e   :  { %265 = vmatprep.subr.mxu1 %v138_v46  ;;  %695 = vmatprep.subr.mxu0 %v190_v59  ;;  %v185_v25 = vld [vmem:[%s1323_s3 + $0x1c8] sm:$0xff]  ;;  %v139_v26 = vld [vmem:[%s1323_s3 + $0x58] sm:$0xff]  ;;  %v184_v28 = vld [vmem:[%s1323_s3 + $0x1c0] sm:$0xff] }
  0x1f   :  { %266 = vmatpush1.msra.mxu1 %v137_v48  ;;  %696 = vmatpush3.msra.mxu0 %v142_v61  ;;  %v183_v27 = vld [vmem:[%s1323_s3 + $0x1b8] sm:$0xff]  ;;  %v182_v29 = vld [vmem:[%s1323_s3 + $0x1b0] sm:$0xff]  ;;  %v136_v30 = vld [vmem:[%s1323_s3 + $0x40] sm:$0xff]  ;;  %v43_v42 = vsub.s32 0, %v1149_v41  ;;  %v47_v44 = vsub.s32 1, %v1149_v41 }
  0x20   :  { %267 = vmatprep.subr.mxu1 %v135_v50  ;;  %697 = vmatprep.subr.mxu0 %v187_v24  ;;  %v180_v31 = vld [vmem:[%s1323_s3 + $0x1a0] sm:$0xff]  ;;  %v181_v32 = vld [vmem:[%s1323_s3 + $0x1a8] sm:$0xff]  ;;  %v179_v33 = vld [vmem:[%s1323_s3 + $0x198] sm:$0xff] }
  0x21   :  { %268 = vmatpush1.msra.mxu1 %v134_v52  ;;  %698 = vmatpush3.msra.mxu0 %v139_v26  ;;  %v133_v34 = vld [vmem:[%s1323_s3 + $0x28] sm:$0xff]  ;;  %v178_v36 = vld [vmem:[%s1323_s3 + $0x190] sm:$0xff]  ;;  %v176_v37 = vld [vmem:[%s1323_s3 + $0x180] sm:$0xff]  ;;  %v236_v26 = vsub.s32 2, %v1149_v41 }
  0x22   :  { %269 = vmatprep.subr.mxu1 %v132_v54  ;;  %699 = vmatprep.subr.mxu0 %v184_v28  ;;  %v177_v35 = vld [vmem:[%s1323_s3 + $0x188] sm:$0xff]  ;;  %v130_v38 = vld [vmem:[%s1323_s3 + $0x10] sm:$0xff]  ;;  %v416_v39 = vld [vmem:[%s1324_s5 + $0xf8] sm:$0xff] }
  0x23   :  { %270 = vmatpush1.msra.mxu1 %v131_v56  ;;  %700 = vmatpush3.msra.mxu0 %v136_v30  ;;  %v39_v43 = vld [vmem:[%s1325_s2] sm:$0x3]  ;;  %v400_v53 = vld [vmem:[%s1324_s5 + $0x78] sm:$0xff]  ;;  %v415_v54 = vld [vmem:[%s1324_s5 + $0xf0] sm:$0xff] }
  0x24   :  { %271 = vmatprep.subr.mxu1 %v129_v58  ;;  %701 = vmatprep.subr.mxu0 %v181_v32  ;;  %v44_v45 = vrot.slane %v39_v43, %v43_v42  ;;  %v48_v46 = vrot.slane %v39_v43, %v47_v44  ;;  %v399_v55 = vld [vmem:[%s1324_s5 + $0x70] sm:$0xff]  ;;  %v414_v56 = vld [vmem:[%s1324_s5 + $0xe8] sm:$0xff]  ;;  %v413_v58 = vld [vmem:[%s1324_s5 + $0xe0] sm:$0xff] }
  0x25   :  { %272 = vmatpush1.msra.mxu1 %v128_v60  ;;  %702 = vmatpush3.msra.mxu0 %v133_v34  ;;  %v398_v57 = vld [vmem:[%s1324_s5 + $0x68] sm:$0xff]  ;;  %v397_v59 = vld [vmem:[%s1324_s5 + $0x60] sm:$0xff]  ;;  %v412_v60 = vld [vmem:[%s1324_s5 + $0xd8] sm:$0xff] }
  0x26   :  { %273 = vmatprep.subr.mxu1 %v222_v62  ;;  %703 = vmatprep.subr.mxu0 %v178_v36  ;;  %v396_v61 = vld [vmem:[%s1324_s5 + $0x58] sm:$0xff]  ;;  %v411_v62 = vld [vmem:[%s1324_s5 + $0xd0] sm:$0xff]  ;;  %v417_v24 = vld [vmem:[%s1324_s5 + $0x100] sm:$0xff] }
  0x27   :  { %274 = vmatpush2.msra.mxu1 %v221_v63  ;;  %704 = vmatpush3.msra.mxu0 %v130_v38  ;;  %v395_v63 = vld [vmem:[%s1324_s5 + $0x50] sm:$0xff]  ;;  %v580_v40 = vld [vmem:[%s1327_s7 + $0x38] sm:$0xff]  ;;  %v578_v43 = vld [vmem:[%s1327_s7 + $0x28] sm:$0xff] }
  0x28   :  { %275 = vmatprep.subr.mxu1 %v219_v0  ;;  %708 = vmatprep.subr.mxu0 %v416_v39  ;;  %v410_v0 = vld [vmem:[%s1324_s5 + $0xc8] sm:$0xff]  ;;  %v579_v41 = vld [vmem:[%s1327_s7 + $0x30] sm:$0xff] }
  0x29   :  { %276 = vmatpush2.msra.mxu1 %v218_v1  ;;  %v394_v1 = vld [vmem:[%s1324_s5 + $0x48] sm:$0xff] }
  0x2a   :  { %277 = vmatprep.subr.mxu1 %v216_v2  ;;  %v409_v2 = vld [vmem:[%s1324_s5 + $0xc0] sm:$0xff] }
  0x2b   :  { %278 = vmatpush2.msra.mxu1 %v215_v4  ;;  %v393_v4 = vld [vmem:[%s1324_s5 + $0x40] sm:$0xff] }
  0x2c   :  { %279 = vmatprep.subr.mxu1 %v213_v5  ;;  %v408_v5 = vld [vmem:[%s1324_s5 + $0xb8] sm:$0xff] }
  0x2d   :  { %280 = vmatpush2.msra.mxu1 %v212_v6  ;;  %v392_v6 = vld [vmem:[%s1324_s5 + $0x38] sm:$0xff] }
  0x2e   :  { %281 = vmatprep.subr.mxu1 %v210_v7  ;;  %v407_v7 = vld [vmem:[%s1324_s5 + $0xb0] sm:$0xff] }
  0x2f   :  { %282 = vmatpush2.msra.mxu1 %v209_v8  ;;  %v391_v8 = vld [vmem:[%s1324_s5 + $0x30] sm:$0xff] }
  0x30   :  { %283 = vmatprep.subr.mxu1 %v207_v9  ;;  %v406_v9 = vld [vmem:[%s1324_s5 + $0xa8] sm:$0xff] }
  0x31   :  { %284 = vmatpush2.msra.mxu1 %v206_v10  ;;  %v390_v10 = vld [vmem:[%s1324_s5 + $0x28] sm:$0xff] }
  0x32   :  { %285 = vmatprep.subr.mxu1 %v204_v11  ;;  %v405_v11 = vld [vmem:[%s1324_s5 + $0xa0] sm:$0xff] }
  0x33   :  { %286 = vmatpush2.msra.mxu1 %v203_v12  ;;  %v389_v12 = vld [vmem:[%s1324_s5 + $0x20] sm:$0xff] }
  0x34   :  { %287 = vmatprep.subr.mxu1 %v201_v13  ;;  %v404_v13 = vld [vmem:[%s1324_s5 + $0x98] sm:$0xff] }
  0x35   :  { %288 = vmatpush2.msra.mxu1 %v200_v14  ;;  %v388_v14 = vld [vmem:[%s1324_s5 + $0x18] sm:$0xff] }
  0x36   :  { %289 = vmatprep.subr.mxu1 %v198_v15  ;;  %v403_v15 = vld [vmem:[%s1324_s5 + $0x90] sm:$0xff] }
  0x37   :  { %290 = vmatpush2.msra.mxu1 %v197_v16  ;;  %v420_v16 = vld [vmem:[%s1324_s5 + $0x118] sm:$0xff] }
  0x38   :  { %291 = vmatprep.subr.mxu1 %v195_v17  ;;  %v387_v17 = vld [vmem:[%s1324_s5 + $0x10] sm:$0xff] }
  0x39   :  { %292 = vmatpush2.msra.mxu1 %v194_v18  ;;  %v402_v18 = vld [vmem:[%s1324_s5 + $0x88] sm:$0xff] }
  0x3a   :  { %293 = vmatprep.subr.mxu1 %v192_v19  ;;  %v419_v19 = vld [vmem:[%s1324_s5 + $0x110] sm:$0xff] }
  0x3b   :  { %294 = vmatpush2.msra.mxu1 %v191_v20  ;;  %v386_v20 = vld [vmem:[%s1324_s5 + $0x8] sm:$0xff] }
  0x3c   :  { %295 = vmatprep.subr.mxu1 %v189_v21  ;;  %v401_v21 = vld [vmem:[%s1324_s5 + $0x80] sm:$0xff] }
  0x3d   :  { %296 = vmatpush2.msra.mxu1 %v188_v22  ;;  %v418_v22 = vld [vmem:[%s1324_s5 + $0x108] sm:$0xff] }
  0x3e   :  { %297 = vmatprep.subr.mxu1 %v186_v23  ;;  %v385_v23 = vld [vmem:[%s1324_s5] sm:$0xff] }
  0x3f   :  { %298 = vmatpush2.msra.mxu1 %v185_v25  ;;  %v224_v25 = vld [vmem:[%s1326_s4] sm:$0x7] }
  0x40   :  { %299 = vmatprep.subr.mxu1 %v183_v27  ;;  %v229_v27 = vrot.slane %v224_v25, %v43_v42  ;;  %v233_v28 = vrot.slane %v224_v25, %v47_v44  ;;  %v577_v44 = vld [vmem:[%s1327_s7 + $0x20] sm:$0xff] }
  0x41   :  { %300 = vmatpush2.msra.mxu1 %v182_v29 }
  0x42   :  { %301 = vmatprep.subr.mxu1 %v180_v31  ;;  %v237_v31 = vrot.slane %v224_v25, %v236_v26 }
  0x43   :  { %302 = vmatpush2.msra.mxu1 %v179_v33 }
  0x44   :  { %303 = vmatprep.subr.mxu1 %v177_v35 }
  0x45   :  { %304 = vmatpush2.msra.mxu1 %v176_v37 }
  0x46   :  { %757 = vmatprep.subr.mxu1 %v789_v3 }
  0xc6   :  { %v121_v47 = vpop.f32.mrf.mxu1 }
  0xc7   :  { %v122_v48 = vadd.f32 %v121_v47, %v44_v45  ;;  %v576_v45 = vld [vmem:[%s1327_s7 + $0x18] sm:$0xff]  ;;  %v574_v47 = vld [vmem:[%s1327_s7 + $0x8] sm:$0xff] }
  0xc8   :  { %v123_v49 = vpop.f32.mrf.mxu1 }
  0xc9   :  { %v124_v50 = vadd.f32 %v123_v49, %v48_v46  ;;  %v126_v52 = vmax.f32 %v122_v48, 0.0  ;;  %v575_v46 = vld [vmem:[%s1327_s7 + $0x10] sm:$0xff]  ;;  %v573_v48 = vld [vmem:[%s1327_s7] sm:$0xff]  ;;  %v14_v49 = vstv %s1328_s8 }
  0xca   :  { %15 = vst [vmem:[#allocation2] sm:$0x1] %v14_v49 }
  0xcb   :  { %v127_v51 = vmax.f32 %v124_v50, 0.0 }
  0xcd   :  { %305 = vmatprep.mubr.f32.mxu1 %v127_v51  ;;  %376 = vmatprep.mubr.f32.mxu0 %v127_v51 }
  0xce   :  { %306 = vmatmul.mubr.f32.vlgmr.msra.gmra.mxu1 %v126_v52  ;;  %377 = vmatmul.mubr.f32.vlgmr.msra.gmra.mxu0 %v126_v52  ;;  %v669_v52 = vld [vmem:[%s1329_s6] ss:$0 sm:$0xff] }
  0xcf   :  { %709 = vmatpush3.msra.mxu0 %v400_v53  ;;  %758 = vmatpush3.msra.mxu1 %v420_v16 }
  0xd0   :  { %710 = vmatprep.subr.mxu0 %v415_v54  ;;  %759 = vmatprep.subr.mxu1 %v789_v3 }
  0xd1   :  { %711 = vmatpush3.msra.mxu0 %v399_v55  ;;  %760 = vmatpush3.msra.mxu1 %v419_v19 }
  0xd2   :  { %712 = vmatprep.subr.mxu0 %v414_v56  ;;  %761 = vmatprep.subr.mxu1 %v789_v3 }
  0xd3   :  { %713 = vmatpush3.msra.mxu0 %v398_v57  ;;  %762 = vmatpush3.msra.mxu1 %v418_v22 }
  0xd4   :  { %714 = vmatprep.subr.mxu0 %v413_v58  ;;  %763 = vmatprep.subr.mxu1 %v789_v3  ;;  %v671_v58 = vld [vmem:[#allocation2] ss:$0 sm:$0xff] }
  0xd5   :  { %715 = vmatpush3.msra.mxu0 %v397_v59  ;;  %764 = vmatpush3.msra.mxu1 %v417_v24 }
  0xd6   :  { %716 = vmatprep.subr.mxu0 %v412_v60  ;;  %765 = vmatprep.mubr.msk.f32.mxu1 %vm790_vm1, %v789_v3 }
  0xd7   :  { %717 = vmatpush3.msra.mxu0 %v396_v61 }
  0xd8   :  { %718 = vmatprep.subr.mxu0 %v411_v62 }
  0xd9   :  { %719 = vmatpush3.msra.mxu0 %v395_v63 }
  0xda   :  { %720 = vmatprep.subr.mxu0 %v410_v0 }
  0xdb   :  { %721 = vmatpush3.msra.mxu0 %v394_v1 }
  0xdc   :  { %722 = vmatprep.subr.mxu0 %v409_v2 }
  0xdd   :  { %723 = vmatpush3.msra.mxu0 %v393_v4 }
  0xde   :  { %724 = vmatprep.subr.mxu0 %v408_v5 }
  0xdf   :  { %725 = vmatpush3.msra.mxu0 %v392_v6 }
  0xe0   :  { %726 = vmatprep.subr.mxu0 %v407_v7 }
  0xe1   :  { %727 = vmatpush3.msra.mxu0 %v391_v8 }
  0xe2   :  { %728 = vmatprep.subr.mxu0 %v406_v9 }
  0xe3   :  { %729 = vmatpush3.msra.mxu0 %v390_v10 }
  0xe4   :  { %730 = vmatprep.subr.mxu0 %v405_v11 }
  0xe5   :  { %731 = vmatpush3.msra.mxu0 %v389_v12 }
  0xe6   :  { %732 = vmatprep.subr.mxu0 %v404_v13 }
  0xe7   :  { %733 = vmatpush3.msra.mxu0 %v388_v14 }
  0xe8   :  { %734 = vmatprep.subr.mxu0 %v403_v15 }
  0xe9   :  { %735 = vmatpush3.msra.mxu0 %v387_v17 }
  0xea   :  { %736 = vmatprep.subr.mxu0 %v402_v18 }
  0xeb   :  { %737 = vmatpush3.msra.mxu0 %v386_v20 }
  0xec   :  { %738 = vmatprep.subr.mxu0 %v401_v21 }
  0xed   :  { %739 = vmatpush3.msra.mxu0 %v385_v23 }
  0xee   :  { %768 = vmatprep.subr.mxu0 %v789_v3 }
 0x18e   :  { %v307_v29 = vpop.f32.mrf.mxu1  ;;  %v705_v30 = vpop.f32.mrf.mxu0 }
 0x18f   :  { %v308_v32 = vadd.f32 %v307_v29, %v229_v27 }
 0x190   :  { %v309_v33 = vpop.f32.mrf.mxu1  ;;  %v706_v34 = vpop.f32.mrf.mxu0 }
 0x191   :  { %v310_v35 = vadd.f32 %v309_v33, %v233_v28  ;;  %v707_v36 = vadd.f32 %v706_v34, %v705_v30  ;;  %v382_v39 = vmax.f32 %v308_v32, 0.0 }
 0x193   :  { %v383_v37 = vmax.f32 %v310_v35, 0.0  ;;  %v379_v38 = vadd.f32 %v707_v36, %v237_v31 }
 0x195   :  { %v384_v42 = vmax.f32 %v379_v38, 0.0  ;;  %496 = vmatprep.mubr.f32.mxu0 %v383_v37 }
 0x196   :  { %497 = vmatmul.mubr.f32.vlgmr.msra.gmra.mxu0 %v382_v39 }
 0x197   :  { %766 = vmatmul.mubr.msk.f32.vlgmr.msra.gmra.mxu1 %vm428_vm2, %v384_v42  ;;  %769 = vmatpush3.msra.mxu0 %v580_v40 }
 0x198   :  { %770 = vmatprep.subr.mxu0 %v789_v3  ;;  %784 = vmatprep.mubr.msk.f32.mxu0 %vm790_vm1, %v789_v3 }
 0x199   :  { %771 = vmatpush3.msra.mxu0 %v579_v41 }
 0x19a   :  { %772 = vmatprep.subr.mxu0 %v789_v3 }
 0x19b   :  { %773 = vmatpush3.msra.mxu0 %v578_v43 }
 0x19c   :  { %774 = vmatprep.subr.mxu0 %v789_v3 }
 0x19d   :  { %775 = vmatpush3.msra.mxu0 %v577_v44 }
 0x19e   :  { %776 = vmatprep.subr.mxu0 %v789_v3 }
 0x19f   :  { %777 = vmatpush3.msra.mxu0 %v576_v45 }
 0x1a0   :  { %778 = vmatprep.subr.mxu0 %v789_v3 }
 0x1a1   :  { %779 = vmatpush3.msra.mxu0 %v575_v46 }
 0x1a2   :  { %780 = vmatprep.subr.mxu0 %v789_v3 }
 0x1a3   :  { %781 = vmatpush3.msra.mxu0 %v574_v47 }
 0x1a4   :  { %782 = vmatprep.subr.mxu0 %v789_v3 }
 0x1a5   :  { %783 = vmatpush3.msra.mxu0 %v573_v48 }
 0x256   :  { %v740_v50 = vpop.f32.mrf.mxu0 }
 0x257   :  { %v568_v51 = vpop.f32.mrf.mxu1 }
 0x258   :  { %v741_v53 = vpop.f32.mrf.mxu0 }
 0x259   :  { %v742_v54 = vadd.f32 %v741_v53, %v740_v50  ;;  %v767_v55 = vpop.f32.mrf.mxu1 }
 0x25b   :  { %v499_v3 = vadd.f32 %v742_v54, %v669_v52 }
 0x25d   :  { %v569_v56 = vadd.f32 %v568_v51, %v499_v3 }
 0x25f   :  { %v572_v57 = vmax.f32 %v569_v56, 0.0 }
 0x261   :  { %785 = vmatmul.mubr.msk.f32.vlgmr.msra.gmra.mxu0 %vm588_vm3, %v572_v57 }
 0x321   :  { %v658_v59 = vpop.f32.mrf.mxu0 }
 0x322   :  { %v659_v60 = vadd.f32 %v671_v58, %v658_v59 }
 0x323   :  { %v786_v61 = vpop.f32.mrf.mxu0 }
 0x324   :  { %663 = vst.msk [vmem:[%s1330_s9] sm:$0xff] %vm662_vm4, %v659_v60 }

</bundles_post_ra>
